<compile_context>
chip_gen: v7x
topology: tpu7x:2x2x1
jax: 0.10.0
libtpu: 0.0.40
codegen_flags: <defaults>
</compile_context>

<pallas_src>
import functools
import math

import jax
import jax.numpy as jnp
from jax import lax
from jax.experimental import pallas as pl
from jax.experimental.pallas import tpu as pltpu

_LANES = 128                 # lane-dense output width (multiple of 128)
_TILE_HALF_ROWS = 1024       # half-rows per grid block -> 1 MiB f32 output block
_SINGLE_HALF_ROWS_MAX = 2048 # below this: one gridless whole-array invocation

_EXP_ONE = 0x3F800000        # bit pattern of 1.0f (exponent only)
_EXP_ONE_LO = 0x3F800001     # same, with low mantissa bit set (keeps log(u1) finite)
_TWO_PI = 2.0 * math.pi


def _boxmuller(b1, b2):
    """Two uint32 bit arrays -> two float32 N(0,1) arrays (both Box-Muller outputs)."""
    exp_one = jnp.uint32(_EXP_ONE)
    exp_one_lo = jnp.uint32(_EXP_ONE_LO)
    # Exponent trick: top 23 bits as mantissa under a 1.0f exponent -> [1, 2);
    # subtract 1.0 -> U[0, 1).  The OR'd low bit keeps u1 >= 2^-23 (no clamp).
    u1 = lax.bitcast_convert_type((b1 >> 9) | exp_one_lo, jnp.float32) - 1.0
    u2 = lax.bitcast_convert_type((b2 >> 9) | exp_one, jnp.float32) - 1.0
    r = jnp.sqrt(-2.0 * jnp.log(u1))
    theta = u2 * jnp.float32(_TWO_PI)
    return r * jnp.cos(theta), r * jnp.sin(theta)


def _prng_normal_kernel(seed_ref, o_ref, *, use_grid):
    """In-kernel PRNG path: SMEM seed -> (2, H, 128) float32 N(0,1) block."""
    step = pl.program_id(0) if use_grid else 0
    # Per-block seed so a "parallel" grid (megacore) never duplicates streams.
    pltpu.prng_seed(seed_ref[0] + step)
    h = o_ref.shape[1]
    b1 = lax.bitcast_convert_type(pltpu.prng_random_bits((h, _LANES)), jnp.uint32)
    b2 = lax.bitcast_convert_type(pltpu.prng_random_bits((h, _LANES)), jnp.uint32)
    z0, z1 = _boxmuller(b1, b2)
    o_ref[0] = z0
    o_ref[1] = z1


def _bits_normal_kernel(bits_ref, o_ref):
    """Fallback path: (H, 128) uint32 (two 16-bit uniforms each) -> (2, H, 128) N(0,1)."""
    bits = bits_ref[...]
    # High 16 bits feed u1 (log argument), low 16 bits (shifted up) feed the angle.
    z0, z1 = _boxmuller(bits & jnp.uint32(0xFFFF0000), bits << 16)
    o_ref[0] = z0
    o_ref[1] = z1


def _cost(half_rows, bits_bytes):
    n = 2 * half_rows * _LANES
    return pl.CostEstimate(flops=12 * n, transcendentals=2 * n,
                           bytes_accessed=4 * n + bits_bytes)


def _normal_slab_prng(seed_arr, half_rows):
    out_shape = jax.ShapeDtypeStruct((2, half_rows, _LANES), jnp.float32)
    if half_rows <= _SINGLE_HALF_ROWS_MAX:
        # Tiny/default case: no grid, no double-buffering, whole-array specs.
        return pl.pallas_call(
            functools.partial(_prng_normal_kernel, use_grid=False),
            in_specs=[pl.BlockSpec(memory_space=pltpu.MemorySpace.SMEM)],
            out_specs=pl.BlockSpec(memory_space=pltpu.MemorySpace.VMEM),
            out_shape=out_shape,
            cost_estimate=_cost(half_rows, 0),
        )(seed_arr)
    nblk = pl.cdiv(half_rows, _TILE_HALF_ROWS)
    return pl.pallas_call(
        functools.partial(_prng_normal_kernel, use_grid=True),
        grid=(nblk,),
        in_specs=[pl.BlockSpec(memory_space=pltpu.MemorySpace.SMEM)],
        out_specs=pl.BlockSpec((2, _TILE_HALF_ROWS, _LANES), lambda i: (0, i, 0)),
        out_shape=out_shape,
        compiler_params=pltpu.CompilerParams(dimension_semantics=("parallel",)),
        cost_estimate=_cost(half_rows, 0),
    )(seed_arr)


def _normal_slab_bits(bits, half_rows):
    out_shape = jax.ShapeDtypeStruct((2, half_rows, _LANES), jnp.float32)
    bits_bytes = half_rows * _LANES * 4
    if half_rows <= _SINGLE_HALF_ROWS_MAX:
        return pl.pallas_call(
            _bits_normal_kernel,
            in_specs=[pl.BlockSpec(memory_space=pltpu.MemorySpace.VMEM)],
            out_specs=pl.BlockSpec(memory_space=pltpu.MemorySpace.VMEM),
            out_shape=out_shape,
            cost_estimate=_cost(half_rows, bits_bytes),
        )(bits)
    nblk = pl.cdiv(half_rows, _TILE_HALF_ROWS)
    return pl.pallas_call(
        _bits_normal_kernel,
        grid=(nblk,),
        in_specs=[pl.BlockSpec((_TILE_HALF_ROWS, _LANES), lambda i: (i, 0))],
        out_specs=pl.BlockSpec((2, _TILE_HALF_ROWS, _LANES), lambda i: (0, i, 0)),
        out_shape=out_shape,
        compiler_params=pltpu.CompilerParams(dimension_semantics=("parallel",)),
        cost_estimate=_cost(half_rows, bits_bytes),
    )(bits)


def _slab_geometry(batch_size, seq_len, vocab_size):
    total = batch_size * seq_len * vocab_size
    # Exact sizing when total % 256 == 0 (default shapes) -> wrapper reshape is
    # a pure metadata op, no extra HBM pass.  Otherwise pad minimally + slice.
    half_rows = max(1, pl.cdiv(total, 2 * _LANES))
    return total, half_rows


def _finish(slab, total, batch_size, seq_len, vocab_size):
    flat = slab.reshape(-1)
    if flat.shape[0] != total:
        flat = flat[:total]
    return flat.reshape(batch_size, seq_len, vocab_size)


@functools.partial(jax.jit, static_argnums=(1, 2, 3))
def _logits_prng(seed_arr, batch_size, seq_len, vocab_size):
    total, half_rows = _slab_geometry(batch_size, seq_len, vocab_size)
    slab = _normal_slab_prng(seed_arr, half_rows)
    return _finish(slab, total, batch_size, seq_len, vocab_size)


@functools.partial(jax.jit, static_argnums=(1, 2, 3))
def _logits_bits(key, batch_size, seq_len, vocab_size):
    total, half_rows = _slab_geometry(batch_size, seq_len, vocab_size)
    bits = jax.random.bits(key, (half_rows, _LANES), dtype=jnp.uint32)
    slab = _normal_slab_bits(bits, half_rows)
    return _finish(slab, total, batch_size, seq_len, vocab_size)


# One-time capability probe: prefer the in-kernel PRNG path (zero bits HBM
# traffic, no threefry pass); fall back to external bits if it fails to lower.
_PRNG_IN_KERNEL = None


def _make_logits(key, batch_size, seq_len, vocab_size):
    """Pallas equivalent of torch.randn(batch_size, seq_len, vocab_size)."""
    global _PRNG_IN_KERNEL
    if _PRNG_IN_KERNEL is None or _PRNG_IN_KERNEL:
        seed_arr = jax.random.randint(key, (1,), 0, jnp.iinfo(jnp.int32).max,
                                      dtype=jnp.int32)
        try:
            out = jax.block_until_ready(
                _logits_prng(seed_arr, batch_size, seq_len, vocab_size))
            _PRNG_IN_KERNEL = True
            return out
        except Exception:
            if _PRNG_IN_KERNEL:   # worked before -> genuine failure, surface it
                raise
            _PRNG_IN_KERNEL = False
    return _logits_bits(key, batch_size, seq_len, vocab_size)


class OptimizedMockModelPallas:
    """JAX/Pallas port of tests/test_common.py::OptimizedMockModel."""

    def __init__(self, vocab_size=16, seed=0):
        self.vocab_size = vocab_size
        self.training = True
        self._key = jax.random.PRNGKey(seed)
        self._cached_logits = {}

    def forward(self, x, y=None):
        batch_size, seq_len = x.shape
        cache_key = (batch_size, seq_len)
        if cache_key not in self._cached_logits:
            k = jax.random.fold_in(
                jax.random.fold_in(self._key, batch_size), seq_len
            )
            self._cached_logits[cache_key] = _make_logits(
                k, batch_size, seq_len, self.vocab_size
            )
        logits = self._cached_logits[cache_key]
        loss = jnp.asarray(1.0, dtype=jnp.float32) if y is not None else None
        return logits, loss

    __call__ = forward

    def generate(self, x, max_new_tokens=1, **kwargs):
        # torch.long -> int32 (JAX default integer width without x64).
        batch_size, _ = x.shape
        new_tokens = jnp.zeros((batch_size, max_new_tokens), dtype=x.dtype)
        return jnp.concatenate([x, new_tokens], axis=1)

    def eval(self):
        self.training = False
        return self

    def train(self):
        self.training = True
        return self

    def to(self, device):
        return self


if __name__ == "__main__":
    key = jax.random.PRNGKey(0)
    kx, ky = jax.random.split(key)

    batch, seq_len, vocab = 2, 8, 16
    x = jax.random.randint(kx, (batch, seq_len), 0, vocab, dtype=jnp.int32)
    y = jax.random.randint(ky, (batch, seq_len), 0, vocab, dtype=jnp.int32)

    model = OptimizedMockModelPallas(vocab_size=vocab)

    # forward without targets -> (logits, None)
    logits, loss_none = model(x)
    logits = jax.block_until_ready(logits)
    assert logits.shape == (batch, seq_len, vocab), logits.shape
    assert logits.dtype == jnp.float32
    assert loss_none is None
    assert bool(jnp.all(jnp.isfinite(logits)))

    # loose distributional sanity: ~N(0, 1) over 256 samples
    mean = float(jnp.mean(logits))
    std = float(jnp.std(logits))
    assert abs(mean) < 0.4, mean
    assert 0.6 < std < 1.4, std

    # forward with targets -> (logits, 1.0); cache must return the same array
    logits2, loss = model(x, y)
    logits2 = jax.block_until_ready(logits2)
    loss = jax.block_until_ready(loss)
    assert logits2 is logits                      # cache hit, like the torch dict
    assert float(loss) == 1.0

    # generate: append max_new_tokens zero columns
    gen = jax.block_until_ready(model.generate(x, max_new_tokens=3))
    assert gen.shape == (batch, seq_len + 3)
    assert bool(jnp.all(gen[:, seq_len:] == 0))
    assert bool(jnp.all(gen[:, :seq_len] == x))

    print("KERNEL_OK")
</pallas_src>

<mosaic_0001>
module attributes {stable_mosaic.version = 11 : i64} {
  func.func @_prng_normal_kernel(%arg0: memref<1xi32, #tpu.memory_space<smem>>, %arg1: memref<2x1x128xf32, #tpu.memory_space<vmem>>) attributes {dimension_semantics = [], scalar_prefetch = 0 : i64, scratch_operands = 0 : i64, tpu.core_type = #tpu.core_type<tc>} {
    %c0 = arith.constant 0 : index
    %0 = memref.load %arg0[%c0] : memref<1xi32, #tpu.memory_space<smem>>
    %c0_i32 = arith.constant 0 : i32
    %1 = arith.addi %0, %c0_i32 : i32
    "tpu.prng_set_seed_32"(%1) : (i32) -> ()
    %2 = "tpu.prng_random_bits"() : () -> vector<1x128xi32>
    %3 = tpu.bitcast %2 : vector<1x128xi32> -> vector<1x128xi32>
    %4 = "tpu.prng_random_bits"() : () -> vector<1x128xi32>
    %5 = tpu.bitcast %4 : vector<1x128xi32> -> vector<1x128xi32>
    %c9_i32 = arith.constant 9 : i32
    %6 = vector.broadcast %c9_i32 : i32 to vector<1x128xi32>
    %7 = arith.shrui %3, %6 : vector<1x128xi32>
    %c1065353217_i32 = arith.constant 1065353217 : i32
    %8 = vector.broadcast %c1065353217_i32 : i32 to vector<1x128xi32>
    %9 = arith.ori %7, %8 : vector<1x128xi32>
    %10 = tpu.bitcast %9 : vector<1x128xi32> -> vector<1x128xf32>
    %cst = arith.constant 1.000000e+00 : f32
    %11 = vector.broadcast %cst : f32 to vector<1x128xf32>
    %12 = arith.subf %10, %11 : vector<1x128xf32>
    %c9_i32_0 = arith.constant 9 : i32
    %13 = vector.broadcast %c9_i32_0 : i32 to vector<1x128xi32>
    %14 = arith.shrui %5, %13 : vector<1x128xi32>
    %c1065353216_i32 = arith.constant 1065353216 : i32
    %15 = vector.broadcast %c1065353216_i32 : i32 to vector<1x128xi32>
    %16 = arith.ori %14, %15 : vector<1x128xi32>
    %17 = tpu.bitcast %16 : vector<1x128xi32> -> vector<1x128xf32>
    %cst_1 = arith.constant 1.000000e+00 : f32
    %18 = vector.broadcast %cst_1 : f32 to vector<1x128xf32>
    %19 = arith.subf %17, %18 : vector<1x128xf32>
    %20 = math.log %12 : vector<1x128xf32>
    %cst_2 = arith.constant -2.000000e+00 : f32
    %21 = vector.broadcast %cst_2 : f32 to vector<1x128xf32>
    %22 = arith.mulf %21, %20 : vector<1x128xf32>
    %23 = math.sqrt %22 : vector<1x128xf32>
    %cst_3 = arith.constant 6.28318548 : f32
    %24 = vector.broadcast %cst_3 : f32 to vector<1x128xf32>
    %25 = arith.mulf %19, %24 : vector<1x128xf32>
    %26 = math.cos %25 : vector<1x128xf32>
    %27 = arith.mulf %23, %26 : vector<1x128xf32>
    %28 = math.sin %25 : vector<1x128xf32>
    %29 = arith.mulf %23, %28 : vector<1x128xf32>
    %c0_4 = arith.constant 0 : index
    %c0_5 = arith.constant 0 : index
    %c0_6 = arith.constant 0 : index
    %30 = vector.load %arg1[%c0_4, %c0_5, %c0_6] : memref<2x1x128xf32, #tpu.memory_space<vmem>>, vector<1x1x128xf32>
    %31 = vector.shape_cast %30 : vector<1x1x128xf32> to vector<1x128xf32>
    %32 = vector.shape_cast %27 : vector<1x128xf32> to vector<1x1x128xf32>
    tpu.vector_store %arg1[%c0_4, %c0_5, %c0_6], %32 {strides = array<i32>} : memref<2x1x128xf32, #tpu.memory_space<vmem>>, vector<1x1x128xf32>,
    %c1 = arith.constant 1 : index
    %c0_7 = arith.constant 0 : index
    %c0_8 = arith.constant 0 : index
    %33 = vector.load %arg1[%c1, %c0_7, %c0_8] : memref<2x1x128xf32, #tpu.memory_space<vmem>>, vector<1x1x128xf32>
    %34 = vector.shape_cast %33 : vector<1x1x128xf32> to vector<1x128xf32>
    %35 = vector.shape_cast %29 : vector<1x128xf32> to vector<1x1x128xf32>
    tpu.vector_store %arg1[%c1, %c0_7, %c0_8], %35 {strides = array<i32>} : memref<2x1x128xf32, #tpu.memory_space<vmem>>, vector<1x1x128xf32>,
    return
  }
}

module attributes {stable_mosaic.version = 11 : i64} {
  func.func @_bits_normal_kernel(%arg0: memref<1x128xi32, #tpu.memory_space<vmem>>, %arg1: memref<2x1x128xf32, #tpu.memory_space<vmem>>) attributes {dimension_semantics = [], scalar_prefetch = 0 : i64, scratch_operands = 0 : i64, tpu.core_type = #tpu.core_type<tc>} {
    %c0 = arith.constant 0 : index
    %c0_0 = arith.constant 0 : index
    %0 = vector.load %arg0[%c0, %c0_0] : memref<1x128xi32, #tpu.memory_space<vmem>>, vector<1x128xi32>
    %c-65536_i32 = arith.constant -65536 : i32
    %1 = vector.broadcast %c-65536_i32 : i32 to vector<1x128xi32>
    %2 = arith.andi %0, %1 : vector<1x128xi32>
    %c16_i32 = arith.constant 16 : i32
    %3 = vector.broadcast %c16_i32 : i32 to vector<1x128xi32>
    %4 = arith.shli %0, %3 : vector<1x128xi32>
    %c9_i32 = arith.constant 9 : i32
    %5 = vector.broadcast %c9_i32 : i32 to vector<1x128xi32>
    %6 = arith.shrui %2, %5 : vector<1x128xi32>
    %c1065353217_i32 = arith.constant 1065353217 : i32
    %7 = vector.broadcast %c1065353217_i32 : i32 to vector<1x128xi32>
    %8 = arith.ori %6, %7 : vector<1x128xi32>
    %9 = tpu.bitcast %8 : vector<1x128xi32> -> vector<1x128xf32>
    %cst = arith.constant 1.000000e+00 : f32
    %10 = vector.broadcast %cst : f32 to vector<1x128xf32>
    %11 = arith.subf %9, %10 : vector<1x128xf32>
    %c9_i32_1 = arith.constant 9 : i32
    %12 = vector.broadcast %c9_i32_1 : i32 to vector<1x128xi32>
    %13 = arith.shrui %4, %12 : vector<1x128xi32>
    %c1065353216_i32 = arith.constant 1065353216 : i32
    %14 = vector.broadcast %c1065353216_i32 : i32 to vector<1x128xi32>
    %15 = arith.ori %13, %14 : vector<1x128xi32>
    %16 = tpu.bitcast %15 : vector<1x128xi32> -> vector<1x128xf32>
    %cst_2 = arith.constant 1.000000e+00 : f32
    %17 = vector.broadcast %cst_2 : f32 to vector<1x128xf32>
    %18 = arith.subf %16, %17 : vector<1x128xf32>
    %19 = math.log %11 : vector<1x128xf32>
    %cst_3 = arith.constant -2.000000e+00 : f32
    %20 = vector.broadcast %cst_3 : f32 to vector<1x128xf32>
    %21 = arith.mulf %20, %19 : vector<1x128xf32>
    %22 = math.sqrt %21 : vector<1x128xf32>
    %cst_4 = arith.constant 6.28318548 : f32
    %23 = vector.broadcast %cst_4 : f32 to vector<1x128xf32>
    %24 = arith.mulf %18, %23 : vector<1x128xf32>
    %25 = math.cos %24 : vector<1x128xf32>
    %26 = arith.mulf %22, %25 : vector<1x128xf32>
    %27 = math.sin %24 : vector<1x128xf32>
    %28 = arith.mulf %22, %27 : vector<1x128xf32>
    %c0_5 = arith.constant 0 : index
    %c0_6 = arith.constant 0 : index
    %c0_7 = arith.constant 0 : index
    %29 = vector.load %arg1[%c0_5, %c0_6, %c0_7] : memref<2x1x128xf32, #tpu.memory_space<vmem>>, vector<1x1x128xf32>
    %30 = vector.shape_cast %29 : vector<1x1x128xf32> to vector<1x128xf32>
    %31 = vector.shape_cast %26 : vector<1x128xf32> to vector<1x1x128xf32>
    tpu.vector_store %arg1[%c0_5, %c0_6, %c0_7], %31 {strides = array<i32>} : memref<2x1x128xf32, #tpu.memory_space<vmem>>, vector<1x1x128xf32>,
    %c1 = arith.constant 1 : index
    %c0_8 = arith.constant 0 : index
    %c0_9 = arith.constant 0 : index
    %32 = vector.load %arg1[%c1, %c0_8, %c0_9] : memref<2x1x128xf32, #tpu.memory_space<vmem>>, vector<1x1x128xf32>
    %33 = vector.shape_cast %32 : vector<1x1x128xf32> to vector<1x128xf32>
    %34 = vector.shape_cast %28 : vector<1x128xf32> to vector<1x1x128xf32>
    tpu.vector_store %arg1[%c1, %c0_8, %c0_9], %34 {strides = array<i32>} : memref<2x1x128xf32, #tpu.memory_space<vmem>>, vector<1x1x128xf32>,
    return
  }
}

</mosaic_0001>

<bundles_post_ra>
// kernel: _logits_prng.1
= control target key start
LH: loop header
LB: loop body
LE: loop exit
PB: predicated region body
PF: predicated region fallthrough
CT: control target
= control target key end

     0   :  { %v10_v0 = vlaneseq  ;;  %s464_s0 = inlined_call_operand.<no memory space> [shape: s32[1], index: 0, kind: input, shape index: {}]   ;;  %s465_s1 = inlined_call_operand.vmem [shape: f32[2,1,128], index: 1, kind: output, shape index: {}]  }
   0x1   :  { %v417_v1 = vstv %s464_s0 }
   0x2   :  { %v14_v2 = vadd.s32 %v417_v1, %v10_v0  ;;  %v12_v17 = vxor.u32 %v417_v1, %v417_v1 }
   0x4   :  { %v15_v3 = vadd.s32 %v14_v2, %v14_v2  ;;  %v16_v4 = vshll.u32 %v14_v2, 13  ;;  %v17_v5 = vshrl.u32 %v14_v2, 19  ;;  %v422_v22 = vxor.u32 466688986, %v12_v17 }
   0x6   :  { %v18_v6 = vor.u32 %v17_v5, %v16_v4 }
   0x8   :  { %v19_v7 = vxor.u32 %v18_v6, %v15_v3 }
   0xa   :  { %v20_v8 = vadd.s32 %v19_v7, %v15_v3  ;;  %v21_v9 = vshll.u32 %v19_v7, 15  ;;  %v22_v10 = vshrl.u32 %v19_v7, 17 }
   0xc   :  { %v23_v11 = vor.u32 %v22_v10, %v21_v9 }
   0xe   :  { %v24_v12 = vxor.u32 %v23_v11, %v20_v8 }
  0x10   :  { %v25_v13 = vadd.s32 %v24_v12, %v20_v8  ;;  %v26_v14 = vshll.u32 %v24_v12, 26  ;;  %v27_v15 = vshrl.u32 %v24_v12, 6 }
  0x12   :  { %v28_v16 = vor.u32 %v27_v15, %v26_v14 }
  0x14   :  { %v29_v18 = vxor.u32 %v28_v16, %v25_v13 }
  0x16   :  { %v30_v19 = vadd.s32 %v29_v18, %v25_v13  ;;  %v31_v20 = vshll.u32 %v29_v18, 6  ;;  %v32_v21 = vshrl.u32 %v29_v18, 26 }
  0x18   :  { %v33_v23 = vor.u32 %v32_v21, %v31_v20  ;;  %v35_v25 = vadd.s32 %v30_v19, %v417_v1 }
  0x1a   :  { %v34_v24 = vxor.u32 %v33_v23, %v30_v19 }
  0x1c   :  { %v36_v26 = vadd.s32 %v34_v24, %v422_v22 }
  0x1e   :  { %v37_v27 = vadd.s32 1, %v36_v26 }
  0x20   :  { %v38_v28 = vadd.s32 %v37_v27, %v35_v25  ;;  %v39_v29 = vshll.u32 %v37_v27, 17  ;;  %v40_v30 = vshrl.u32 %v37_v27, 15 }
  0x22   :  { %v41_v31 = vor.u32 %v40_v30, %v39_v29 }
  0x24   :  { %v42_v32 = vxor.u32 %v41_v31, %v38_v28 }
  0x26   :  { %v43_v33 = vadd.s32 %v42_v32, %v38_v28  ;;  %v44_v34 = vshll.u32 %v42_v32, 29  ;;  %v45_v35 = vshrl.u32 %v42_v32, 3 }
  0x28   :  { %v46_v36 = vor.u32 %v45_v35, %v44_v34 }
  0x2a   :  { %v47_v37 = vxor.u32 %v46_v36, %v43_v33 }
  0x2c   :  { %v48_v38 = vadd.s32 %v47_v37, %v43_v33  ;;  %v49_v39 = vshll.u32 %v47_v37, 16  ;;  %v50_v40 = vshrl.u32 %v47_v37, 16 }
  0x2e   :  { %v51_v41 = vor.u32 %v50_v40, %v49_v39 }
  0x30   :  { %v52_v42 = vxor.u32 %v51_v41, %v48_v38 }
  0x32   :  { %v53_v43 = vadd.s32 %v52_v42, %v48_v38  ;;  %v54_v44 = vshll.u32 %v52_v42, 24  ;;  %v55_v45 = vshrl.u32 %v52_v42, 8 }
  0x34   :  { %v56_v46 = vor.u32 %v55_v45, %v54_v44  ;;  %v58_v48 = vadd.s32 %v53_v43, %v422_v22 }
  0x36   :  { %v57_v47 = vxor.u32 %v56_v46, %v53_v43 }
  0x38   :  { %v59_v49 = vadd.s32 %v57_v47, %v417_v1 }
  0x3a   :  { %v60_v50 = vadd.s32 2, %v59_v49 }
  0x3c   :  { %v61_v51 = vadd.s32 %v60_v50, %v58_v48  ;;  %v62_v52 = vshll.u32 %v60_v50, 13  ;;  %v63_v53 = vshrl.u32 %v60_v50, 19 }
  0x3e   :  { %v64_v54 = vor.u32 %v63_v53, %v62_v52 }
  0x40   :  { %v65_v55 = vxor.u32 %v64_v54, %v61_v51 }
  0x42   :  { %v66_v56 = vadd.s32 %v65_v55, %v61_v51  ;;  %v67_v57 = vshll.u32 %v65_v55, 15  ;;  %v68_v58 = vshrl.u32 %v65_v55, 17 }
  0x44   :  { %v69_v59 = vor.u32 %v68_v58, %v67_v57 }
  0x46   :  { %v70_v60 = vxor.u32 %v69_v59, %v66_v56 }
  0x48   :  { %v71_v61 = vadd.s32 %v70_v60, %v66_v56  ;;  %v72_v62 = vshll.u32 %v70_v60, 26  ;;  %v73_v63 = vshrl.u32 %v70_v60, 6 }
  0x4a   :  { %v74_v0 = vor.u32 %v73_v63, %v72_v62 }
  0x4c   :  { %v75_v2 = vxor.u32 %v74_v0, %v71_v61 }
  0x4e   :  { %v76_v3 = vadd.s32 %v75_v2, %v71_v61  ;;  %v77_v4 = vshll.u32 %v75_v2, 6  ;;  %v78_v5 = vshrl.u32 %v75_v2, 26 }
  0x50   :  { %v79_v6 = vor.u32 %v78_v5, %v77_v4  ;;  %v81_v8 = vadd.s32 %v76_v3, %v417_v1 }
  0x52   :  { %v80_v7 = vxor.u32 %v79_v6, %v76_v3 }
  0x54   :  { %v82_v9 = vadd.s32 %v80_v7, %v417_v1 }
  0x56   :  { %v83_v10 = vadd.s32 3, %v82_v9 }
  0x58   :  { %v84_v11 = vadd.s32 %v83_v10, %v81_v8  ;;  %v85_v12 = vshll.u32 %v83_v10, 17  ;;  %v86_v13 = vshrl.u32 %v83_v10, 15 }
  0x5a   :  { %v87_v14 = vor.u32 %v86_v13, %v85_v12  ;;  %v399_v13 = vmov 2475754826  }
  0x5c   :  { %v88_v15 = vxor.u32 %v87_v14, %v84_v11 }
  0x5e   :  { %v89_v16 = vadd.s32 %v88_v15, %v84_v11  ;;  %v90_v17 = vshll.u32 %v88_v15, 29  ;;  %v91_v18 = vshrl.u32 %v88_v15, 3  ;;  %v398_v11 = vmov 683565275  }
  0x60   :  { %v92_v19 = vor.u32 %v91_v18, %v90_v17 }
  0x62   :  { %v93_v20 = vxor.u32 %v92_v19, %v89_v16  ;;  %v401_v19 = vmov 2102212464  }
  0x64   :  { %v94_v21 = vadd.s32 %v93_v20, %v89_v16  ;;  %v95_v23 = vshll.u32 %v93_v20, 16  ;;  %v96_v24 = vshrl.u32 %v93_v20, 16  ;;  %v400_v16 = vmov 2131351028  }
  0x66   :  { %v97_v25 = vor.u32 %v96_v24, %v95_v23  ;;  %v402_v23 = vmov 920167782  }
  0x68   :  { %v98_v26 = vxor.u32 %v97_v25, %v94_v21 }
  0x6a   :  { %v99_v27 = vadd.s32 %v98_v26, %v94_v21  ;;  %v100_v28 = vshll.u32 %v98_v26, 24  ;;  %v101_v29 = vshrl.u32 %v98_v26, 8  ;;  %v403_v26 = vmov 1326507024  }
  0x6c   :  { %v102_v30 = vor.u32 %v101_v29, %v100_v28  ;;  %v104_v32 = vadd.s32 %v99_v27, %v417_v1 }
  0x6e   :  { %v103_v31 = vxor.u32 %v102_v30, %v99_v27 }
  0x70   :  { %v105_v33 = vadd.s32 %v103_v31, %v422_v22 }
  0x72   :  { %v106_v34 = vadd.s32 4, %v105_v33 }
  0x74   :  { %v107_v35 = vadd.s32 %v106_v34, %v104_v32  ;;  %v108_v36 = vshll.u32 %v106_v34, 13  ;;  %v109_v37 = vshrl.u32 %v106_v34, 19 }
  0x76   :  { %v110_v38 = vor.u32 %v109_v37, %v108_v36 }
  0x78   :  { %v111_v39 = vxor.u32 %v110_v38, %v107_v35 }
  0x7a   :  { %v112_v40 = vadd.s32 %v111_v39, %v107_v35  ;;  %v113_v41 = vshll.u32 %v111_v39, 15  ;;  %v114_v42 = vshrl.u32 %v111_v39, 17 }
  0x7c   :  { %v115_v43 = vor.u32 %v114_v42, %v113_v41 }
  0x7e   :  { %v116_v44 = vxor.u32 %v115_v43, %v112_v40 }
  0x80   :  { %v117_v45 = vadd.s32 %v116_v44, %v112_v40  ;;  %v118_v46 = vshll.u32 %v116_v44, 26  ;;  %v119_v47 = vshrl.u32 %v116_v44, 6 }
  0x82   :  { %v120_v48 = vor.u32 %v119_v47, %v118_v46 }
  0x84   :  { %v121_v49 = vxor.u32 %v120_v48, %v117_v45 }
  0x86   :  { %v122_v50 = vadd.s32 %v121_v49, %v117_v45  ;;  %v123_v51 = vshll.u32 %v121_v49, 6  ;;  %v124_v52 = vshrl.u32 %v121_v49, 26 }
  0x88   :  { %v125_v53 = vor.u32 %v124_v52, %v123_v51  ;;  %v127_v55 = vadd.s32 %v122_v50, %v422_v22 }
  0x8a   :  { %v126_v54 = vxor.u32 %v125_v53, %v122_v50 }
  0x8c   :  { %v128_v56 = vadd.s32 %v126_v54, %v417_v1 }
  0x8e   :  { %v129_v57 = vadd.s32 5, %v128_v56 }
  0x90   :  { %v130_v58 = vxor.u32 %v129_v57, %v127_v55 }
  0x92   :  { %131 = set.rngseed %v130_v58 }
  0x93   :  { %v434_v59 = vrng }
  0x94   :  { %v133_v60 = vrng  ;;  %v134_v52 = vshrl.u32 %v434_v59, 9 }
  0x95   :  { %v138_v61 = vshrl.u32 %v133_v60, 9 }
  0x96   :  { %v135_v56 = vor.u32 1065353217, %v134_v52 }
  0x97   :  { %v139_v62 = vor.u32 1065353216, %v138_v61 }
  0x98   :  { %v369_v60 = vadd.f32 -1.0, %v135_v56 }
  0x99   :  { %v370_v63 = vadd.f32 -1.0, %v139_v62 }
  0x9a   :  { %390 = vlog2.f32 %v369_v60 }
  0x9b   :  { %v436_v0 = vmul.f32 6.2831855, %v370_v63 }
  0x9d   :  { %v156_v2 = vand.u32 2139095040, %v436_v0  ;;  %v153_v5 = vand.u32 2147483647, %v436_v0  ;;  %vm155_vm7 = vcmp.lt.s32.totalorder %v436_v0, 0 }
  0x9f   :  { %v157_v3 = vshrl.u32 %v156_v2, 23  ;;  %v160_v6 = vand.u32 8388607, %v153_v5  ;;  %vm154_vm8 = vcmp.le.f32.partialorder %v153_v5, 0.7853982 }
  0xa1   :  { %v371_v4 = vadd.s32 4294967169, %v157_v3  ;;  %v161_v9 = vor.u32 8388608, %v160_v6 }
  0xa3   :  { %v163_v22 = vadd.s32 1, %v371_v4  ;;  %v201_v33 = vshll.u32 %v161_v9, 8 }
  0xa5   :  { %vm164_vm0 = vcmp.gt.s32.totalorder %v163_v22, 0 }
  0xa6   :  { %v165_v1 = vsel %vm164_vm0, %v163_v22, 0 }
  0xa7   :  { %v167_v7 = vand.u32 31, %v165_v1  ;;  %v166_v10 = vshrl.u32 %v165_v1, 5  ;;  %v391_v1 = vpop.eup %390 }
  0xa9   :  { %v168_v8 = vsub.s32 32, %v167_v7  ;;  %v170_v12 = vshll.u32 %v398_v11, %v167_v7  ;;  %v173_v14 = vshll.u32 %v399_v13, %v167_v7  ;;  %v176_v18 = vshll.u32 %v400_v16, %v167_v7 }
  0xaa   :  { %v179_v21 = vshll.u32 %v401_v19, %v167_v7  ;;  %v182_v25 = vshll.u32 %v402_v23, %v167_v7  ;;  %vm185_vm1 = vcmp.lt.s32.totalorder %v166_v10, 1  ;;  %vm187_vm2 = vcmp.lt.s32.totalorder %v166_v10, 3 }
  0xab   :  { %v171_v15 = vshrl.u32 %v399_v13, %v168_v8  ;;  %v174_v17 = vshrl.u32 %v400_v16, %v168_v8  ;;  %v177_v20 = vshrl.u32 %v401_v19, %v168_v8  ;;  %v180_v24 = vshrl.u32 %v402_v23, %v168_v8 }
  0xac   :  { %v183_v27 = vshrl.u32 %v403_v26, %v168_v8  ;;  %vm188_vm3 = vcmp.lt.s32.totalorder %v166_v10, 4  ;;  %v169_v39 = vshrl.u32 %v398_v11, %v168_v8  ;;  %vm186_vm4 = vcmp.lt.s32.totalorder %v166_v10, 2 }
  0xad   :  { %v172_v28 = vor.u32 %v171_v15, %v170_v12  ;;  %v175_v29 = vor.u32 %v174_v17, %v173_v14  ;;  %v178_v30 = vor.u32 %v177_v20, %v176_v18  ;;  %v181_v31 = vor.u32 %v180_v24, %v179_v21 }
  0xae   :  { %v184_v32 = vor.u32 %v183_v27, %v182_v25  ;;  %v143_v11 = vmul.f32 0.6931472, %v391_v1 }
  0xaf   :  { %v193_v34 = vsel %vm185_vm1, %v172_v28, %v175_v29  ;;  %v197_v35 = vsel %vm185_vm1, %v175_v29, %v178_v30  ;;  %v190_v36 = vsel %vm188_vm3, %v178_v30, 2102212464  ;;  %v194_v37 = vsel %vm188_vm3, %v181_v31, 920167782 }
  0xb0   :  { %v198_v38 = vsel %vm188_vm3, %v184_v32, 1326507024  ;;  %v195_v40 = vsel %vm187_vm2, %v178_v30, %v194_v37  ;;  %v189_v44 = vsel %vm185_vm1, %v169_v39, %v172_v28  ;;  %v191_v45 = vsel %vm187_vm2, %v175_v29, %v190_v36 }
  0xb1   :  { %v199_v41 = vsel %vm187_vm2, %v181_v31, %v198_v38  ;;  %v196_v42 = vsel %vm186_vm4, %v193_v34, %v195_v40  ;;  %v192_v50 = vsel %vm186_vm4, %v189_v44, %v191_v45  ;;  %v144_v15 = vmul.f32 -2.0, %v143_v11 }
  0xb2   :  { %v200_v43 = vsel %vm186_vm4, %v197_v35, %v199_v41  ;;  %v445_v48 = vmul.u32.u64.low %v201_v33, %v196_v42  ;;  %v446_v49 = vmul.u32.u64.high %v201_v33, %v196_v42, %v445_v48  ;;  %v208_v53 = vmul.u32 %v201_v33, %v192_v50 }
  0xb3   :  { %v442_v46 = vmul.u32.u64.low %v201_v33, %v200_v43  ;;  %v443_v47 = vmul.u32.u64.high %v201_v33, %v200_v43, %v442_v46  ;;  %392 = vrsqrt.f32 %v144_v15  ;;  %vm147_vm9 = vcmp.eq.f32.partialorder %v144_v15, inf }
  0xb4   :  { %v211_v51 = vadd.s32 1, %v446_v49  ;;  %v150_v33 = vand.u32 2147483648, %v144_v15  ;;  %vm149_vm0 = vcmp.eq.f32.partialorder %v144_v15, 0.0  ;;  %vm245_vm1 = vweird.f32 %v436_v0 }
  0xb5   :  { %vm210_vm5 = vc.u32 %v443_v47, %v445_v48  ;;  %v209_v59 = vadd.s32 %v445_v48, %v443_v47 }
  0xb6   :  { %v212_v54 = vsel %vm210_vm5, %v211_v51, %v446_v49 }
  0xb7   :  { %v213_v55 = vadd.s32 %v212_v54, %v208_v53 }
  0xb9   :  { %v214_v57 = vadd.s32 536870912, %v213_v55 }
  0xbb   :  { %v215_v58 = vshrl.u32 %v214_v57, 30 }
  0xbd   :  { %v216_v61 = vshll.u32 %v215_v58, 30  ;;  %v239_v19 = vsub.s32 4, %v215_v58  ;;  %v393_v27 = vpop.eup %392 }
  0xbe   :  { %v146_v28 = vmul.f32 %v393_v27, %v144_v15 }
  0xbf   :  { %v217_v62 = vsub.s32 %v213_v55, %v216_v61  ;;  %v240_v23 = vsel %vm155_vm7, %v239_v19, %v215_v58 }
  0xc0   :  { %v242_v25 = vsel %vm154_vm8, 0, %v240_v23  ;;  %v148_v35 = vsel %vm147_vm9, %v144_v15, %v146_v28 }
  0xc1   :  { %v219_v63 = vsub.s32 0, %v217_v62  ;;  %v350_v26 = vadd.s32 3, %v242_v25  ;;  %v246_v29 = vand.u32 3, %v242_v25  ;;  %v151_v42 = vsel %vm149_vm0, %v150_v33, %v148_v35 }
  0xc3   :  { %v372_v2 = vmin.u32 %v219_v63, %v217_v62  ;;  %v351_v30 = vand.u32 3, %v350_v26  ;;  %vm251_vm10 = vcmp.eq.s32.totalorder %v246_v29, 2  ;;  %vm248_vm12 = vcmp.eq.s32.totalorder %v246_v29, 0 }
  0xc4   :  { %vm247_vm14 = vcmp.lt.s32.totalorder %v246_v29, 2 }
  0xc5   :  { %v221_v3 = vclz %v372_v2  ;;  %vm356_vm11 = vcmp.eq.s32.totalorder %v351_v30, 2  ;;  %vm353_vm13 = vcmp.eq.s32.totalorder %v351_v30, 0  ;;  %vm352_vm15 = vcmp.lt.s32.totalorder %v351_v30, 2 }
  0xc7   :  { %v373_v4 = vadd.s32 4294967294, %v221_v3 }
  0xc9   :  { %vm374_vm6 = vcmp.lt.s32.totalorder %v373_v4, 0 }
  0xca   :  { %v224_v22 = vsel %vm374_vm6, 0, %v373_v4 }
  0xcb   :  { %v225_v6 = vsub.s32 32, %v224_v22  ;;  %v229_v7 = vsub.s32 4294967266, %v224_v22  ;;  %v226_v8 = vshll.u32 %v217_v62, %v224_v22 }
  0xcd   :  { %v227_v9 = vshrl.u32 %v209_v59, %v225_v6  ;;  %v230_v10 = vadd.s32 127, %v229_v7 }
  0xcf   :  { %v228_v12 = vor.u32 %v227_v9, %v226_v8  ;;  %v231_v13 = vshll.u32 %v230_v10, 23 }
  0xd1   :  { %v232_v14 = vor.u32 4788187, %v231_v13  ;;  %v235_v17 = vcvt.s32.f32 %v228_v12 }
  0xd3   :  { %v233_v16 = vand.u32 2147483647, %v232_v14 }
  0xd5   :  { %v236_v18 = vmul.f32 %v235_v17, %v233_v16 }
  0xd7   :  { %v237_v20 = vxor.u32 2147483648, %v236_v18 }
  0xd9   :  { %v238_v21 = vsel %vm155_vm7, %v237_v20, %v236_v18 }
  0xda   :  { %v241_v24 = vsel %vm154_vm8, %v436_v0, %v238_v21 }
  0xdb   :  { %394 = vcosq.f32 %v241_v24 }
  0xdc   :  { %396 = vsinq.f32 %v241_v24 }
  0xe5   :  { %v395_v31 = vpop.eup %394 }
  0xe6   :  { %v397_v32 = vpop.eup %396  ;;  %v252_v34 = vxor.u32 2147483648, %v395_v31 }
  0xe7   :  { %v249_v36 = vxor.u32 2147483648, %v397_v32 }
  0xe8   :  { %v253_v5 = vsel %vm251_vm10, %v252_v34, %v397_v32  ;;  %v358_v37 = vsel %vm356_vm11, %v252_v34, %v397_v32 }
  0xe9   :  { %v250_v38 = vsel %vm248_vm12, %v395_v31, %v249_v36  ;;  %v355_v39 = vsel %vm353_vm13, %v395_v31, %v249_v36 }
  0xea   :  { %v254_v40 = vsel %vm247_vm14, %v250_v38, %v253_v5  ;;  %v359_v41 = vsel %vm352_vm15, %v355_v39, %v358_v37 }
  0xeb   :  { %v255_v43 = vsel %vm245_vm1, nan, %v254_v40  ;;  %v360_v44 = vsel %vm245_vm1, nan, %v359_v41 }
  0xec   :  { %v256_v45 = vmul.f32 %v255_v43, %v151_v42  ;;  %v361_v46 = vmul.f32 %v360_v44, %v151_v42 }
  0xee   :  { %362 = vst [vmem:[%s465_s1] sm:$0x1] %v256_v45  ;;  %379 = vst [vmem:[%s465_s1 + $0x1] sm:$0x1] %v361_v46 }

// kernel: _logits_bits.1
= control target key start
LH: loop header
LB: loop body
LE: loop exit
PB: predicated region body
PF: predicated region fallthrough
CT: control target
= control target key end

     0   :  { %v275_v17 = vmov 683565275   ;;  %v276_v19 = vmov 2475754826   ;;  %v277_v21 = vmov 2131351028   ;;  %s325_s0 = inlined_call_operand.vmem [shape: u32[1,128], index: 0, kind: input, shape index: {}]   ;;  %s326_s1 = inlined_call_operand.vmem [shape: f32[2,1,128], index: 1, kind: output, shape index: {}]  }
   0x1   :  { %v294_v0 = vld [vmem:[%s325_s0] sm:$0x1]  ;;  %v278_v27 = vmov 2102212464   ;;  %v279_v30 = vmov 920167782  }
   0x2   :  { %v10_v1 = vshll.u32 %v294_v0, 16  ;;  %v280_v33 = vmov 1326507024   ;;  %v9_v49 = vand.u32 4294901760, %v294_v0 }
   0x4   :  { %v15_v2 = vshrl.u32 %v10_v1, 9  ;;  %v11_v58 = vshrl.u32 %v9_v49, 9 }
   0x6   :  { %v16_v3 = vor.u32 1065353216, %v15_v2  ;;  %v12_v62 = vor.u32 1065353217, %v11_v58 }
   0x8   :  { %v247_v4 = vadd.f32 -1.0, %v16_v3  ;;  %v246_v1 = vadd.f32 -1.0, %v12_v62 }
   0xa   :  { %v297_v5 = vmul.f32 6.2831855, %v247_v4  ;;  %267 = vlog2.f32 %v246_v1 }
   0xc   :  { %v33_v6 = vand.u32 2139095040, %v297_v5  ;;  %v30_v7 = vand.u32 2147483647, %v297_v5  ;;  %vm32_vm7 = vcmp.lt.s32.totalorder %v297_v5, 0 }
   0xe   :  { %v34_v8 = vshrl.u32 %v33_v6, 23  ;;  %v37_v10 = vand.u32 8388607, %v30_v7  ;;  %vm31_vm8 = vcmp.le.f32.partialorder %v30_v7, 0.7853982 }
  0x10   :  { %v248_v9 = vadd.s32 4294967169, %v34_v8  ;;  %v38_v12 = vor.u32 8388608, %v37_v10 }
  0x12   :  { %v40_v11 = vadd.s32 1, %v248_v9  ;;  %v78_v23 = vshll.u32 %v38_v12, 8 }
  0x14   :  { %vm41_vm0 = vcmp.gt.s32.totalorder %v40_v11, 0 }
  0x15   :  { %v42_v13 = vsel %vm41_vm0, %v40_v11, 0  ;;  %v268_v11 = vpop.eup %267 }
  0x16   :  { %v44_v14 = vand.u32 31, %v42_v13  ;;  %v43_v15 = vshrl.u32 %v42_v13, 5 }
  0x18   :  { %v45_v16 = vsub.s32 32, %v44_v14  ;;  %v47_v18 = vshll.u32 %v275_v17, %v44_v14  ;;  %v50_v20 = vshll.u32 %v276_v19, %v44_v14  ;;  %v53_v22 = vshll.u32 %v277_v21, %v44_v14 }
  0x19   :  { %v56_v29 = vshll.u32 %v278_v27, %v44_v14  ;;  %v59_v32 = vshll.u32 %v279_v30, %v44_v14  ;;  %vm62_vm1 = vcmp.lt.s32.totalorder %v43_v15, 1  ;;  %vm63_vm2 = vcmp.lt.s32.totalorder %v43_v15, 2 }
  0x1a   :  { %v46_v24 = vshrl.u32 %v275_v17, %v45_v16  ;;  %v48_v25 = vshrl.u32 %v276_v19, %v45_v16  ;;  %v51_v26 = vshrl.u32 %v277_v21, %v45_v16  ;;  %v54_v28 = vshrl.u32 %v278_v27, %v45_v16 }
  0x1b   :  { %v57_v31 = vshrl.u32 %v279_v30, %v45_v16  ;;  %v60_v34 = vshrl.u32 %v280_v33, %v45_v16  ;;  %vm64_vm3 = vcmp.lt.s32.totalorder %v43_v15, 3  ;;  %vm65_vm4 = vcmp.lt.s32.totalorder %v43_v15, 4 }
  0x1c   :  { %v49_v35 = vor.u32 %v48_v25, %v47_v18  ;;  %v52_v36 = vor.u32 %v51_v26, %v50_v20  ;;  %v55_v37 = vor.u32 %v54_v28, %v53_v22  ;;  %v20_v16 = vmul.f32 0.6931472, %v268_v11 }
  0x1d   :  { %v58_v38 = vor.u32 %v57_v31, %v56_v29  ;;  %v61_v39 = vor.u32 %v60_v34, %v59_v32 }
  0x1e   :  { %v66_v40 = vsel %vm62_vm1, %v46_v24, %v49_v35  ;;  %v70_v41 = vsel %vm62_vm1, %v49_v35, %v52_v36  ;;  %v74_v42 = vsel %vm62_vm1, %v52_v36, %v55_v37  ;;  %v67_v43 = vsel %vm65_vm4, %v55_v37, 2102212464 }
  0x1f   :  { %v71_v44 = vsel %vm65_vm4, %v58_v38, 920167782  ;;  %v75_v45 = vsel %vm65_vm4, %v61_v39, 1326507024  ;;  %v68_v46 = vsel %vm64_vm3, %v52_v36, %v67_v43  ;;  %v21_v21 = vmul.f32 -2.0, %v20_v16 }
  0x20   :  { %v72_v47 = vsel %vm64_vm3, %v55_v37, %v71_v44  ;;  %v76_v48 = vsel %vm64_vm3, %v58_v38, %v75_v45  ;;  %v69_v50 = vsel %vm63_vm2, %v66_v40, %v68_v46  ;;  %vm122_vm1 = vweird.f32 %v297_v5 }
  0x21   :  { %v73_v51 = vsel %vm63_vm2, %v70_v41, %v72_v47  ;;  %v77_v52 = vsel %vm63_vm2, %v74_v42, %v76_v48  ;;  %v85_v57 = vmul.u32 %v78_v23, %v69_v50  ;;  %269 = vrsqrt.f32 %v21_v21 }
  0x22   :  { %v304_v53 = vmul.u32.u64.low %v78_v23, %v77_v52  ;;  %v305_v54 = vmul.u32.u64.high %v78_v23, %v77_v52, %v304_v53  ;;  %v307_v55 = vmul.u32.u64.low %v78_v23, %v73_v51  ;;  %v308_v56 = vmul.u32.u64.high %v78_v23, %v73_v51, %v307_v55 }
  0x23   :  { %vm24_vm9 = vcmp.eq.f32.partialorder %v21_v21, inf  ;;  %vm26_vm10 = vcmp.eq.f32.partialorder %v21_v21, 0.0  ;;  %v27_v38 = vand.u32 2147483648, %v21_v21 }
  0x24   :  { %vm87_vm5 = vc.u32 %v305_v54, %v307_v55  ;;  %v88_v59 = vadd.s32 1, %v308_v56  ;;  %v86_v10 = vadd.s32 %v307_v55, %v305_v54 }
  0x26   :  { %v89_v60 = vsel %vm87_vm5, %v88_v59, %v308_v56 }
  0x27   :  { %v90_v61 = vadd.s32 %v89_v60, %v85_v57 }
  0x29   :  { %v91_v63 = vadd.s32 536870912, %v90_v61 }
  0x2b   :  { %v92_v0 = vshrl.u32 %v91_v63, 30  ;;  %v270_v33 = vpop.eup %269 }
  0x2c   :  { %v23_v36 = vmul.f32 %v270_v33, %v21_v21 }
  0x2d   :  { %v93_v2 = vshll.u32 %v92_v0, 30  ;;  %v116_v25 = vsub.s32 4, %v92_v0 }
  0x2e   :  { %v25_v39 = vsel %vm24_vm9, %v21_v21, %v23_v36 }
  0x2f   :  { %v94_v3 = vsub.s32 %v90_v61, %v93_v2  ;;  %v117_v28 = vsel %vm32_vm7, %v116_v25, %v92_v0  ;;  %v28_v44 = vsel %vm26_vm10, %v27_v38, %v25_v39 }
  0x30   :  { %v119_v31 = vsel %vm31_vm8, 0, %v117_v28 }
  0x31   :  { %v96_v4 = vsub.s32 0, %v94_v3  ;;  %v227_v32 = vadd.s32 3, %v119_v31  ;;  %v123_v34 = vand.u32 3, %v119_v31 }
  0x33   :  { %v249_v6 = vmin.u32 %v96_v4, %v94_v3  ;;  %v228_v35 = vand.u32 3, %v227_v32  ;;  %vm128_vm11 = vcmp.eq.s32.totalorder %v123_v34, 2  ;;  %vm125_vm13 = vcmp.eq.s32.totalorder %v123_v34, 0 }
  0x34   :  { %vm124_vm15 = vcmp.lt.s32.totalorder %v123_v34, 2 }
  0x35   :  { %v98_v8 = vclz %v249_v6  ;;  %vm233_vm12 = vcmp.eq.s32.totalorder %v228_v35, 2  ;;  %vm230_vm14 = vcmp.eq.s32.totalorder %v228_v35, 0  ;;  %vm229_vm0 = vcmp.lt.s32.totalorder %v228_v35, 2 }
  0x37   :  { %v250_v9 = vadd.s32 4294967294, %v98_v8 }
  0x39   :  { %vm251_vm6 = vcmp.lt.s32.totalorder %v250_v9, 0 }
  0x3a   :  { %v101_v12 = vsel %vm251_vm6, 0, %v250_v9 }
  0x3b   :  { %v102_v13 = vsub.s32 32, %v101_v12  ;;  %v103_v14 = vshll.u32 %v94_v3, %v101_v12  ;;  %v106_v15 = vsub.s32 4294967266, %v101_v12 }
  0x3d   :  { %v104_v17 = vshrl.u32 %v86_v10, %v102_v13  ;;  %v107_v18 = vadd.s32 127, %v106_v15 }
  0x3f   :  { %v105_v19 = vor.u32 %v104_v17, %v103_v14  ;;  %v108_v20 = vshll.u32 %v107_v18, 23 }
  0x41   :  { %v109_v22 = vor.u32 4788187, %v108_v20  ;;  %v112_v23 = vcvt.s32.f32 %v105_v19 }
  0x43   :  { %v110_v24 = vand.u32 2147483647, %v109_v22 }
  0x45   :  { %v113_v26 = vmul.f32 %v112_v23, %v110_v24 }
  0x47   :  { %v114_v27 = vxor.u32 2147483648, %v113_v26 }
  0x49   :  { %v115_v29 = vsel %vm32_vm7, %v114_v27, %v113_v26 }
  0x4a   :  { %v118_v30 = vsel %vm31_vm8, %v297_v5, %v115_v29 }
  0x4b   :  { %271 = vcosq.f32 %v118_v30 }
  0x4c   :  { %273 = vsinq.f32 %v118_v30 }
  0x55   :  { %v272_v37 = vpop.eup %271 }
  0x56   :  { %v274_v7 = vpop.eup %273  ;;  %v129_v40 = vxor.u32 2147483648, %v272_v37 }
  0x57   :  { %v126_v41 = vxor.u32 2147483648, %v274_v7 }
  0x58   :  { %v130_v42 = vsel %vm128_vm11, %v129_v40, %v274_v7  ;;  %v235_v43 = vsel %vm233_vm12, %v129_v40, %v274_v7 }
  0x59   :  { %v127_v45 = vsel %vm125_vm13, %v272_v37, %v126_v41  ;;  %v232_v46 = vsel %vm230_vm14, %v272_v37, %v126_v41 }
  0x5a   :  { %v131_v47 = vsel %vm124_vm15, %v127_v45, %v130_v42  ;;  %v236_v48 = vsel %vm229_vm0, %v232_v46, %v235_v43 }
  0x5b   :  { %v132_v49 = vsel %vm122_vm1, nan, %v131_v47  ;;  %v237_v50 = vsel %vm122_vm1, nan, %v236_v48 }
  0x5c   :  { %v133_v51 = vmul.f32 %v132_v49, %v28_v44  ;;  %v238_v52 = vmul.f32 %v237_v50, %v28_v44 }
  0x5e   :  { %239 = vst [vmem:[%s326_s1] sm:$0x1] %v133_v51  ;;  %256 = vst [vmem:[%s326_s1 + $0x1] sm:$0x1] %v238_v52 }

</bundles_post_ra>
